<compile_context>
chip_gen: v6e
topology: v6e:2x2x1
jax: 0.10.0
libtpu: 0.0.40
codegen_flags: <defaults>
</compile_context>

<pallas_src>
import functools

import jax
import jax.numpy as jnp
from jax.experimental import pallas as pl
from jax.experimental.pallas import tpu as pltpu


def _round_up(x, m):
    return ((x + m - 1) // m) * m


def _generator_kernel(x_ref, w1_ref, b1_ref, w2_ref, b2_ref, o_ref):
    # Linear 1 + ReLU: MXU matmul with f32 accumulation; bias add / relu on VPU.
    h = jnp.dot(x_ref[...], w1_ref[...], preferred_element_type=jnp.float32)
    h = jnp.maximum(h + b1_ref[...], 0.0)
    # Linear 2 + Tanh (tanh runs on the EUP, off the VALU critical path).
    # With bf16 weights the post-ReLU activations are down-cast before the
    # second matmul (standard mixed precision); accumulation stays f32.
    y = jnp.dot(h.astype(w2_ref.dtype), w2_ref[...],
                preferred_element_type=jnp.float32)
    o_ref[...] = jnp.tanh(y + b2_ref[...]).astype(o_ref.dtype)


def _vmem_budget_bytes():
    """Physical VMEM with 25% headroom; conservative 64 MiB default (v7x)."""
    phys = 64 * 2**20
    try:
        phys = int(pltpu.get_tpu_info().vmem_capacity_bytes)
    except Exception:
        pass
    return (phys * 3) // 4


def _vmem_footprint(d_in, hidden, bx, bw):
    """(fixed_bytes, per_batch_row_bytes) matching the BlockSpecs below.
    Lane dims rounded to 128, sublane dims to 8 (conservative)."""
    d_l = _round_up(d_in, 128)
    h_l = _round_up(hidden, 128)
    fixed = (
        _round_up(d_in, 8) * h_l * bw          # W1 (resident, single-buffered)
        + _round_up(hidden, 8) * d_l * bw      # W2 (resident, single-buffered)
        + 8 * h_l * 4 + 8 * d_l * 4            # biases (sublane-padded)
    )
    per_row = (
        2 * d_l * bx                            # x tile (double-buffered)
        + 2 * d_l * bx                          # out tile (double-buffered)
        + h_l * 4                               # f32 hidden activations
        + d_l * 4                               # f32 pre-tanh activations
    )
    return fixed, per_row


@functools.partial(jax.jit, static_argnames=("block_b",))
def generator_forward(x, w1, b1, w2, b2, *, block_b=None):
    """x: (B, D_in); w1: (D_in, H); b1: (1, H); w2: (H, D_in); b2: (1, D_in).

    Weights should be padded once at load time via `pad_generator_params`
    (hidden dim -> multiple of 128); the kernel is correct either way since
    full-extent blocks are always legal.
    """
    B, d_in = x.shape
    d_in_w, H = w1.shape
    assert d_in_w == d_in and w2.shape == (H, d_in)
    assert b1.shape == (1, H) and b2.shape == (1, d_in)

    # ---- static tiling decisions (shapes are trace-time constants) ----------
    sublane = 16 if x.dtype == jnp.bfloat16 else 8
    bx = jnp.dtype(x.dtype).itemsize
    bw = jnp.dtype(w1.dtype).itemsize

    fixed, per_row = _vmem_footprint(d_in, H, bx, bw)
    vmem_cap = _vmem_budget_bytes()
    avail = vmem_cap - fixed - (2 << 20)        # slack for sems / misc scratch
    max_b = max(sublane, avail // per_row) if avail > 0 else sublane
    max_b = min(max_b, 256 * sublane)           # 2048 rows f32 / 4096 rows bf16

    if block_b is None:
        # Single full-extent tile whenever the whole batch fits the VMEM
        # budget (never split tiny work across grid steps); otherwise the
        # largest sublane-aligned tile that fits.
        block_b = B if B <= max_b else (max_b // sublane) * sublane

    if block_b >= B:
        block_b, b_pad = B, B                    # full-extent block: no batch pad
    else:
        block_b = max(sublane, (block_b // sublane) * sublane)
        b_pad = _round_up(B, block_b)
    grid = (b_pad // block_b,)

    # Explicit batch zero-pad only when multiple tiles are needed and the
    # batch is ragged (padded rows are sliced off afterwards).
    xp = x if b_pad == B else jnp.pad(x, ((0, b_pad - B), (0, 0)))

    # ---- VMEM limit (>= actual need, generation-aware cap) -------------------
    needed = fixed + block_b * per_row
    vmem_limit = int(min(vmem_cap, max(16 * 2**20, 2 * needed)))

    cost = pl.CostEstimate(
        flops=int(4 * b_pad * d_in * H),
        transcendentals=int(b_pad * d_in),
        bytes_accessed=int(
            xp.size * bx
            + w1.size * jnp.dtype(w1.dtype).itemsize
            + w2.size * jnp.dtype(w2.dtype).itemsize
            + b1.size * jnp.dtype(b1.dtype).itemsize
            + b2.size * jnp.dtype(b2.dtype).itemsize
            + b_pad * d_in * bx
        ),
    )

    # Weights / biases never change across grid steps -> single-buffer them
    # (saves VMEM); x / out keep default double-buffering to hide their DMAs.
    resident = pl.Buffered(1)

    out_p = pl.pallas_call(
        _generator_kernel,
        out_shape=jax.ShapeDtypeStruct((b_pad, d_in), x.dtype),
        grid_spec=pltpu.PrefetchScalarGridSpec(
            num_scalar_prefetch=0,
            grid=grid,
            in_specs=[
                pl.BlockSpec((block_b, d_in), lambda i: (i, 0)),       # x tile
                pl.BlockSpec((d_in, H), lambda i: (0, 0),
                             pipeline_mode=resident),                   # W1
                pl.BlockSpec((1, H), lambda i: (0, 0),
                             pipeline_mode=resident),                   # b1
                pl.BlockSpec((H, d_in), lambda i: (0, 0),
                             pipeline_mode=resident),                   # W2
                pl.BlockSpec((1, d_in), lambda i: (0, 0),
                             pipeline_mode=resident),                   # b2
            ],
            out_specs=pl.BlockSpec((block_b, d_in), lambda i: (i, 0)),
        ),
        compiler_params=pltpu.CompilerParams(
            dimension_semantics=("parallel",),
            vmem_limit_bytes=vmem_limit,
        ),
        cost_estimate=cost,
    )(xp, w1, b1, w2, b2)

    return out_p if b_pad == B else out_p[:B]


def pad_generator_params(w1, b1, w2, b2):
    """One-time (load-time) zero-pad of the hidden dim to a multiple of 128.
    Padded W1 columns / b1 entries are zero -> relu gives exact zeros there,
    and the matching padded W2 rows contribute nothing: math is unchanged."""
    H = w1.shape[1]
    h_pad = _round_up(H, 128)
    if h_pad == H:
        return w1, b1, w2, b2
    return (jnp.pad(w1, ((0, 0), (0, h_pad - H))),
            jnp.pad(b1, ((0, 0), (0, h_pad - H))),
            jnp.pad(w2, ((0, h_pad - H), (0, 0))),
            b2)


def init_generator_params(key, input_dim, hidden_dim, dtype=jnp.float32):
    """Deterministic synthetic init (PyTorch-Linear-like uniform bounds)."""
    k1, k2, k3, k4 = jax.random.split(key, 4)
    lim1 = 1.0 / (input_dim ** 0.5)
    lim2 = 1.0 / (hidden_dim ** 0.5)
    # Stored already transposed: (in, out)
    w1 = jax.random.uniform(k1, (input_dim, hidden_dim), dtype, -lim1, lim1)
    b1 = jax.random.uniform(k2, (1, hidden_dim), dtype, -lim1, lim1)
    w2 = jax.random.uniform(k3, (hidden_dim, input_dim), dtype, -lim2, lim2)
    b2 = jax.random.uniform(k4, (1, input_dim), dtype, -lim2, lim2)
    return w1, b1, w2, b2


def _reference(x, w1, b1, w2, b2):
    return jnp.tanh(jnp.maximum(x @ w1 + b1, 0.0) @ w2 + b2)


if __name__ == "__main__":
    # Module spec uses hidden_dim = 256; small input_dim / batch.
    batch, input_dim, hidden = 256, 32, 256

    key = jax.random.PRNGKey(0)
    kx, kp = jax.random.split(key)
    x = jax.random.normal(kx, (batch, input_dim), jnp.float32)
    w1, b1, w2, b2 = init_generator_params(kp, input_dim, hidden)
    # Pad the hidden dim ONCE at parameter-load time (outside the forward).
    w1p, b1p, w2p, b2p = pad_generator_params(w1, b1, w2, b2)

    # Full batch: single grid step, full-extent tile, no padding round-trips.
    out = jax.block_until_ready(generator_forward(x, w1p, b1p, w2p, b2p))
    ref = _reference(x, w1, b1, w2, b2)
    assert out.shape == (batch, input_dim)
    assert jnp.allclose(out, ref, atol=1e-4, rtol=1e-4)

    # Ragged batch: still a single full-extent tile (no pad, no slice).
    x2 = x[:50]
    out2 = jax.block_until_ready(generator_forward(x2, w1p, b1p, w2p, b2p))
    assert out2.shape == (50, input_dim)
    assert jnp.allclose(out2, _reference(x2, w1, b1, w2, b2),
                        atol=1e-4, rtol=1e-4)

    # Multi-tile path (forced small tile) with ragged batch -> batch zero-pad,
    # "parallel" grid axis (sharded across TCs on v7x).
    x3 = x[:200]
    out3 = jax.block_until_ready(
        generator_forward(x3, w1p, b1p, w2p, b2p, block_b=64))
    assert out3.shape == (200, input_dim)
    assert jnp.allclose(out3, _reference(x3, w1, b1, w2, b2),
                        atol=1e-4, rtol=1e-4)

    print("KERNEL_OK")
</pallas_src>

<mosaic_0001>
module attributes {stable_mosaic.version = 11 : i64} {
  func.func @_generator_kernel(%arg0: i32, %arg1: memref<256x32xf32, #tpu.memory_space<vmem>>, %arg2: memref<32x256xf32, #tpu.memory_space<vmem>>, %arg3: memref<1x256xf32, #tpu.memory_space<vmem>>, %arg4: memref<256x32xf32, #tpu.memory_space<vmem>>, %arg5: memref<1x32xf32, #tpu.memory_space<vmem>>, %arg6: memref<256x32xf32, #tpu.memory_space<vmem>>) attributes {dimension_semantics = [#tpu.dimension_semantics<parallel>], iteration_bounds = array<i64: 1>, scalar_prefetch = 0 : i64, scratch_operands = 0 : i64, tpu.core_type = #tpu.core_type<tc>, window_params = [{transform_indices = @transform_0, window_bounds = array<i64: 256, 32>}, {pipeline_mode = #tpu.pipeline_mode<synchronous>, transform_indices = @transform_1, window_bounds = array<i64: 32, 256>}, {pipeline_mode = #tpu.pipeline_mode<synchronous>, transform_indices = @transform_2, window_bounds = array<i64: 1, 256>}, {pipeline_mode = #tpu.pipeline_mode<synchronous>, transform_indices = @transform_3, window_bounds = array<i64: 256, 32>}, {pipeline_mode = #tpu.pipeline_mode<synchronous>, transform_indices = @transform_4, window_bounds = array<i64: 1, 32>}, {transform_indices = @transform_5, window_bounds = array<i64: 256, 32>}]} {
    %c0 = arith.constant 0 : index
    %c0_0 = arith.constant 0 : index
    %0 = vector.load %arg1[%c0, %c0_0] : memref<256x32xf32, #tpu.memory_space<vmem>>, vector<256x32xf32>
    %c0_1 = arith.constant 0 : index
    %c0_2 = arith.constant 0 : index
    %1 = vector.load %arg2[%c0_1, %c0_2] : memref<32x256xf32, #tpu.memory_space<vmem>>, vector<32x256xf32>
    %cst = arith.constant dense<0.000000e+00> : vector<256x256xf32>
    %2 = tpu.matmul %0, %1, %cst {dimension_numbers = #tpu.dot_dimension_numbers<[1], [0], [0], [1], [0, 0, 1, 1], [], []>} : vector<256x32xf32>, vector<32x256xf32>, vector<256x256xf32> -> vector<256x256xf32>
    %c0_3 = arith.constant 0 : index
    %c0_4 = arith.constant 0 : index
    %3 = vector.load %arg3[%c0_3, %c0_4] : memref<1x256xf32, #tpu.memory_space<vmem>>, vector<1x256xf32>
    %4 = vector.broadcast %3 : vector<1x256xf32> to vector<256x256xf32>
    %5 = arith.addf %2, %4 : vector<256x256xf32>
    %cst_5 = arith.constant 0.000000e+00 : f32
    %6 = vector.broadcast %cst_5 : f32 to vector<256x256xf32>
    %7 = arith.maximumf %5, %6 : vector<256x256xf32>
    %c0_6 = arith.constant 0 : index
    %c0_7 = arith.constant 0 : index
    %8 = vector.load %arg4[%c0_6, %c0_7] : memref<256x32xf32, #tpu.memory_space<vmem>>, vector<256x32xf32>
    %cst_8 = arith.constant dense<0.000000e+00> : vector<256x32xf32>
    %9 = tpu.matmul %7, %8, %cst_8 {dimension_numbers = #tpu.dot_dimension_numbers<[1], [0], [0], [1], [0, 0, 1, 1], [], []>} : vector<256x256xf32>, vector<256x32xf32>, vector<256x32xf32> -> vector<256x32xf32>
    %c0_9 = arith.constant 0 : index
    %c0_10 = arith.constant 0 : index
    %10 = vector.load %arg5[%c0_9, %c0_10] : memref<1x32xf32, #tpu.memory_space<vmem>>, vector<1x32xf32>
    %11 = vector.broadcast %10 : vector<1x32xf32> to vector<256x32xf32>
    %12 = arith.addf %9, %11 : vector<256x32xf32>
    %13 = math.tanh %12 : vector<256x32xf32>
    %c0_11 = arith.constant 0 : index
    %c0_12 = arith.constant 0 : index
    %14 = vector.load %arg6[%c0_11, %c0_12] : memref<256x32xf32, #tpu.memory_space<vmem>>, vector<256x32xf32>
    tpu.vector_store %arg6[%c0_11, %c0_12], %13 {strides = array<i32>} : memref<256x32xf32, #tpu.memory_space<vmem>>, vector<256x32xf32>,
    return
  }
  func.func @transform_0(%arg0: i32) -> (i32, i32) {
    %c0_i32 = arith.constant 0 : i32
    %c0_i32_0 = arith.constant 0 : i32
    return %arg0, %c0_i32 : i32, i32
  }
  func.func @transform_1(%arg0: i32) -> (i32, i32) {
    %c0_i32 = arith.constant 0 : i32
    %c0_i32_0 = arith.constant 0 : i32
    %c0_i32_1 = arith.constant 0 : i32
    return %c0_i32, %c0_i32_0 : i32, i32
  }
  func.func @transform_2(%arg0: i32) -> (i32, i32) {
    %c0_i32 = arith.constant 0 : i32
    %c0_i32_0 = arith.constant 0 : i32
    %c0_i32_1 = arith.constant 0 : i32
    return %c0_i32, %c0_i32_0 : i32, i32
  }
  func.func @transform_3(%arg0: i32) -> (i32, i32) {
    %c0_i32 = arith.constant 0 : i32
    %c0_i32_0 = arith.constant 0 : i32
    %c0_i32_1 = arith.constant 0 : i32
    return %c0_i32, %c0_i32_0 : i32, i32
  }
  func.func @transform_4(%arg0: i32) -> (i32, i32) {
    %c0_i32 = arith.constant 0 : i32
    %c0_i32_0 = arith.constant 0 : i32
    %c0_i32_1 = arith.constant 0 : i32
    return %c0_i32, %c0_i32_0 : i32, i32
  }
  func.func @transform_5(%arg0: i32) -> (i32, i32) {
    %c0_i32 = arith.constant 0 : i32
    %c0_i32_0 = arith.constant 0 : i32
    return %arg0, %c0_i32 : i32, i32
  }
}

</mosaic_0001>

<bundles_post_ra>
// kernel: generator_forward.1
= control target key start
LH: loop header
LB: loop body
LE: loop exit
PB: predicated region body
PF: predicated region fallthrough
CT: control target
= control target key end

     0   :  { %v984_v3 = vmov 0.0   ;;  %vm72_vm0 = vcmask 261120   ;;  %s1667_s1 = inlined_call_operand.vmem [shape: f32[32,256], index: 1, kind: input, shape index: {}]   ;;  %s1668_s0 = inlined_call_operand.vmem [shape: f32[256,32], index: 0, kind: input, shape index: {}]   ;;  %s1669_s3 = inlined_call_operand.vmem [shape: f32[256,32], index: 3, kind: input, shape index: {}]   ;;  %s1670_s2 = inlined_call_operand.vmem [shape: f32[1,256], index: 2, kind: input, shape index: {}]   ;;  %s1671_s4 = inlined_call_operand.vmem [shape: f32[1,32], index: 4, kind: input, shape index: {}]   ;;  %s1672_s5 = inlined_call_operand.vmem [shape: f32[256,32], index: 5, kind: output, shape index: {}]  }
   0x1   :  { %v59_v0 = vld [vmem:[%s1667_s1 + $0x38] sm:$0xff]  ;;  %v58_v1 = vld [vmem:[%s1667_s1 + $0x30] sm:$0xff]  ;;  %v57_v2 = vld [vmem:[%s1667_s1 + $0x28] sm:$0xff]  ;;  %233 = vmatprep.mubr.f32.mxu0 %v984_v3  ;;  %855 = vmatprep.subr.mxu1 %v984_v3 }
   0x2   :  { %193 = vmatprep.subr.mxu0 %v59_v0  ;;  %v56_v4 = vld [vmem:[%s1667_s1 + $0x20] sm:$0xff]  ;;  %v55_v5 = vld [vmem:[%s1667_s1 + $0x18] sm:$0xff]  ;;  %v54_v6 = vld [vmem:[%s1667_s1 + $0x10] sm:$0xff] }
   0x3   :  { %194 = vmatpush1.msra.mxu0 %v58_v1  ;;  %v53_v7 = vld [vmem:[%s1667_s1 + $0x8] sm:$0xff]  ;;  %v52_v8 = vld [vmem:[%s1667_s1] sm:$0xff]  ;;  %v505_v11 = vld [vmem:[%s1669_s3 + $0x78] sm:$0xff] }
   0x4   :  { %195 = vmatprep.subr.mxu0 %v57_v2  ;;  %v20_v9 = vld [vmem:[%s1668_s0] sm:$0xff]  ;;  %v21_v10 = vld [vmem:[%s1668_s0 + $0x8] sm:$0xff]  ;;  %v504_v12 = vld [vmem:[%s1669_s3 + $0x70] sm:$0xff]  ;;  %887 = vmatpush1.msra.mxu1 %v505_v11 }
   0x5   :  { %196 = vmatpush1.msra.mxu0 %v56_v4  ;;  %v22_v13 = vld [vmem:[%s1668_s0 + $0x10] sm:$0xff]  ;;  %v503_v14 = vld [vmem:[%s1669_s3 + $0x68] sm:$0xff]  ;;  %856 = vmatprep.subr.mxu1 %v984_v3  ;;  %v502_v15 = vld [vmem:[%s1669_s3 + $0x60] sm:$0xff] }
   0x6   :  { %197 = vmatprep.subr.mxu0 %v55_v5  ;;  %v23_v16 = vld [vmem:[%s1668_s0 + $0x18] sm:$0xff]  ;;  %888 = vmatpush1.msra.mxu1 %v504_v12  ;;  %v500_v18 = vld [vmem:[%s1669_s3 + $0x50] sm:$0xff]  ;;  %v24_v19 = vld [vmem:[%s1668_s0 + $0x20] sm:$0xff] }
   0x7   :  { %198 = vmatpush1.msra.mxu0 %v54_v6  ;;  %v501_v17 = vld [vmem:[%s1669_s3 + $0x58] sm:$0xff]  ;;  %857 = vmatprep.subr.mxu1 %v984_v3  ;;  %v499_v20 = vld [vmem:[%s1669_s3 + $0x48] sm:$0xff]  ;;  %v498_v21 = vld [vmem:[%s1669_s3 + $0x40] sm:$0xff] }
   0x8   :  { %199 = vmatprep.subr.mxu0 %v53_v7  ;;  %889 = vmatpush1.msra.mxu1 %v503_v14  ;;  %v25_v22 = vld [vmem:[%s1668_s0 + $0x28] sm:$0xff]  ;;  %v497_v23 = vld [vmem:[%s1669_s3 + $0x38] sm:$0xff]  ;;  %v496_v24 = vld [vmem:[%s1669_s3 + $0x30] sm:$0xff] }
   0x9   :  { %200 = vmatpush1.msra.mxu0 %v52_v8  ;;  %858 = vmatprep.subr.mxu1 %v984_v3  ;;  %v26_v25 = vld [vmem:[%s1668_s0 + $0x30] sm:$0xff]  ;;  %v1121_v26 = vld [vmem:[%s1669_s3 + $0x28] sm:$0xff]  ;;  %v1129_v27 = vld [vmem:[%s1669_s3 + $0x20] sm:$0xff] }
   0xa   :  { %822 = vmatmul.mubr.msk.f32.vlgmr.msra.gmra.mxu0 %vm72_vm0, %v20_v9  ;;  %529 = vmatprep.subr.mxu0 %v984_v3  ;;  %v27_v28 = vld [vmem:[%s1668_s0 + $0x38] sm:$0xff]  ;;  %v1149_v30 = vld [vmem:[%s1669_s3 + $0x10] sm:$0xff]  ;;  %v28_v31 = vld [vmem:[%s1668_s0 + $0x40] sm:$0xff] }
   0xb   :  { %239 = vmatprep.mubr.f32.mxu0 %v984_v3  ;;  %530 = vmatpush1.msra.mxu0 %v505_v11  ;;  %v1140_v29 = vld [vmem:[%s1669_s3 + $0x18] sm:$0xff]  ;;  %v1160_v32 = vld [vmem:[%s1669_s3 + $0x8] sm:$0xff]  ;;  %v1169_v33 = vld [vmem:[%s1669_s3] sm:$0xff] }
   0xc   :  { %531 = vmatprep.subr.mxu0 %v984_v3  ;;  %890 = vmatpush1.msra.mxu1 %v502_v15  ;;  %v29_v34 = vld [vmem:[%s1668_s0 + $0x48] sm:$0xff]  ;;  %v1180_v35 = vld [vmem:[%s1669_s3 + $0xf8] sm:$0xff]  ;;  %v1189_v36 = vld [vmem:[%s1669_s3 + $0xf0] sm:$0xff] }
   0xd   :  { %532 = vmatpush1.msra.mxu0 %v504_v12  ;;  %859 = vmatprep.subr.mxu1 %v984_v3  ;;  %v30_v37 = vld [vmem:[%s1668_s0 + $0x50] sm:$0xff]  ;;  %v1200_v38 = vld [vmem:[%s1669_s3 + $0xe8] sm:$0xff]  ;;  %v1209_v39 = vld [vmem:[%s1669_s3 + $0xe0] sm:$0xff] }
   0xe   :  { %823 = vmatmul.mubr.msk.f32.gmra.mxu0 %vm72_vm0, %v21_v10  ;;  %533 = vmatprep.subr.mxu0 %v984_v3  ;;  %v31_v40 = vld [vmem:[%s1668_s0 + $0x58] sm:$0xff]  ;;  %v1229_v42 = vld [vmem:[%s1669_s3 + $0xd0] sm:$0xff]  ;;  %v32_v43 = vld [vmem:[%s1668_s0 + $0x60] sm:$0xff]  ;;  %v62_v10 = vlaneseq }
   0xf   :  { %245 = vmatprep.mubr.f32.mxu0 %v984_v3  ;;  %534 = vmatpush1.msra.mxu0 %v503_v14  ;;  %v1220_v41 = vld [vmem:[%s1669_s3 + $0xd8] sm:$0xff]  ;;  %v1240_v44 = vld [vmem:[%s1669_s3 + $0xc8] sm:$0xff]  ;;  %v1250_v45 = vld [vmem:[%s1669_s3 + $0xc0] sm:$0xff] }
  0x10   :  { %535 = vmatprep.subr.mxu0 %v984_v3  ;;  %891 = vmatpush1.msra.mxu1 %v501_v17  ;;  %v33_v46 = vld [vmem:[%s1668_s0 + $0x68] sm:$0xff]  ;;  %v1261_v47 = vld [vmem:[%s1669_s3 + $0xb8] sm:$0xff]  ;;  %v1271_v48 = vld [vmem:[%s1669_s3 + $0xb0] sm:$0xff]  ;;  %v63_v11 = vshrl.u32 %v62_v10, 7 }
  0x11   :  { %536 = vmatpush1.msra.mxu0 %v502_v15  ;;  %860 = vmatprep.subr.mxu1 %v984_v3  ;;  %v34_v49 = vld [vmem:[%s1668_s0 + $0x70] sm:$0xff]  ;;  %v1283_v50 = vld [vmem:[%s1669_s3 + $0xa8] sm:$0xff]  ;;  %v1292_v51 = vld [vmem:[%s1669_s3 + $0xa0] sm:$0xff] }
  0x12   :  { %824 = vmatmul.mubr.msk.f32.gmra.mxu0 %vm72_vm0, %v22_v13  ;;  %537 = vmatprep.subr.mxu0 %v984_v3  ;;  %v35_v52 = vld [vmem:[%s1668_s0 + $0x78] sm:$0xff]  ;;  %v36_v53 = vld [vmem:[%s1668_s0 + $0x80] sm:$0xff]  ;;  %v37_v55 = vld [vmem:[%s1668_s0 + $0x88] sm:$0xff]  ;;  %v64_v12 = vsub.s32 0, %v63_v11  ;;  %v68_v14 = vsub.s32 1, %v63_v11 }
  0x13   :  { %251 = vmatprep.mubr.f32.mxu0 %v984_v3  ;;  %538 = vmatpush1.msra.mxu0 %v501_v17  ;;  %v509_v54 = vld [vmem:[%s1669_s3 + $0x98] sm:$0xff]  ;;  %v508_v56 = vld [vmem:[%s1669_s3 + $0x90] sm:$0xff]  ;;  %v507_v57 = vld [vmem:[%s1669_s3 + $0x88] sm:$0xff] }
  0x14   :  { %539 = vmatprep.subr.mxu0 %v984_v3  ;;  %892 = vmatpush1.msra.mxu1 %v500_v18  ;;  %v38_v58 = vld [vmem:[%s1668_s0 + $0x90] sm:$0xff]  ;;  %v506_v59 = vld [vmem:[%s1669_s3 + $0x80] sm:$0xff]  ;;  %v39_v60 = vld [vmem:[%s1668_s0 + $0x98] sm:$0xff] }
  0x15   :  { %540 = vmatpush1.msra.mxu0 %v500_v18  ;;  %861 = vmatprep.subr.mxu1 %v984_v3  ;;  %v40_v61 = vld [vmem:[%s1668_s0 + $0xa0] sm:$0xff]  ;;  %v41_v62 = vld [vmem:[%s1668_s0 + $0xa8] sm:$0xff]  ;;  %v42_v63 = vld [vmem:[%s1668_s0 + $0xb0] sm:$0xff] }
  0x16   :  { %825 = vmatmul.mubr.msk.f32.gmra.mxu0 %vm72_vm0, %v23_v16  ;;  %541 = vmatprep.subr.mxu0 %v984_v3  ;;  %v43_v0 = vld [vmem:[%s1668_s0 + $0xb8] sm:$0xff]  ;;  %v44_v1 = vld [vmem:[%s1668_s0 + $0xc0] sm:$0xff]  ;;  %v45_v2 = vld [vmem:[%s1668_s0 + $0xc8] sm:$0xff] }
  0x17   :  { %257 = vmatprep.mubr.f32.mxu0 %v984_v3  ;;  %542 = vmatpush1.msra.mxu0 %v499_v20  ;;  %v46_v4 = vld [vmem:[%s1668_s0 + $0xd0] sm:$0xff]  ;;  %v47_v5 = vld [vmem:[%s1668_s0 + $0xd8] sm:$0xff]  ;;  %v48_v6 = vld [vmem:[%s1668_s0 + $0xe0] sm:$0xff] }
  0x18   :  { %543 = vmatprep.subr.mxu0 %v984_v3  ;;  %893 = vmatpush1.msra.mxu1 %v499_v20  ;;  %v49_v7 = vld [vmem:[%s1668_s0 + $0xe8] sm:$0xff]  ;;  %v50_v8 = vld [vmem:[%s1668_s0 + $0xf0] sm:$0xff]  ;;  %v51_v9 = vld [vmem:[%s1668_s0 + $0xf8] sm:$0xff] }
  0x19   :  { %544 = vmatpush1.msra.mxu0 %v498_v21  ;;  %862 = vmatprep.subr.mxu1 %v984_v3  ;;  %v60_v13 = vld [vmem:[%s1670_s2] sm:$0x3] }
  0x1a   :  { %826 = vmatmul.mubr.msk.f32.gmra.mxu0 %vm72_vm0, %v24_v19  ;;  %545 = vmatprep.subr.mxu0 %v984_v3  ;;  %v1434_v15 = vrot.slane %v60_v13, %v64_v12  ;;  %v1436_v16 = vrot.slane %v60_v13, %v68_v14 }
  0x1b   :  { %263 = vmatprep.mubr.f32.mxu0 %v984_v3  ;;  %546 = vmatpush1.msra.mxu0 %v497_v23 }
  0x1c   :  { %547 = vmatprep.subr.mxu0 %v984_v3  ;;  %894 = vmatpush1.msra.mxu1 %v498_v21 }
  0x1d   :  { %548 = vmatpush1.msra.mxu0 %v496_v24  ;;  %863 = vmatprep.subr.mxu1 %v984_v3 }
  0x1e   :  { %827 = vmatmul.mubr.msk.f32.gmra.mxu0 %vm72_vm0, %v25_v22  ;;  %549 = vmatprep.subr.mxu0 %v984_v3 }
  0x1f   :  { %269 = vmatprep.mubr.f32.mxu0 %v984_v3  ;;  %550 = vmatpush1.msra.mxu0 %v1121_v26 }
  0x20   :  { %551 = vmatprep.subr.mxu0 %v984_v3  ;;  %895 = vmatpush1.msra.mxu1 %v497_v23 }
  0x21   :  { %552 = vmatpush1.msra.mxu0 %v1129_v27  ;;  %864 = vmatprep.subr.mxu1 %v984_v3 }
  0x22   :  { %828 = vmatmul.mubr.msk.f32.gmra.mxu0 %vm72_vm0, %v26_v25  ;;  %553 = vmatprep.subr.mxu0 %v984_v3 }
  0x23   :  { %275 = vmatprep.mubr.f32.mxu0 %v984_v3  ;;  %554 = vmatpush1.msra.mxu0 %v1140_v29 }
  0x24   :  { %555 = vmatprep.subr.mxu0 %v984_v3  ;;  %896 = vmatpush1.msra.mxu1 %v496_v24 }
  0x25   :  { %556 = vmatpush1.msra.mxu0 %v1149_v30  ;;  %865 = vmatprep.subr.mxu1 %v984_v3 }
  0x26   :  { %829 = vmatmul.mubr.msk.f32.gmra.mxu0 %vm72_vm0, %v27_v28  ;;  %557 = vmatprep.subr.mxu0 %v984_v3 }
  0x27   :  { %281 = vmatprep.mubr.f32.mxu0 %v984_v3  ;;  %558 = vmatpush1.msra.mxu0 %v1160_v32 }
  0x28   :  { %559 = vmatprep.subr.mxu0 %v984_v3  ;;  %897 = vmatpush1.msra.mxu1 %v1121_v26 }
  0x29   :  { %560 = vmatpush1.msra.mxu0 %v1169_v33  ;;  %866 = vmatprep.subr.mxu1 %v984_v3 }
  0x2a   :  { %830 = vmatmul.mubr.msk.f32.gmra.mxu0 %vm72_vm0, %v28_v31  ;;  %561 = vmatprep.subr.mxu0 %v984_v3 }
  0x2b   :  { %287 = vmatprep.mubr.f32.mxu0 %v984_v3  ;;  %562 = vmatpush2.msra.mxu0 %v1180_v35 }
  0x2c   :  { %563 = vmatprep.subr.mxu0 %v984_v3  ;;  %898 = vmatpush1.msra.mxu1 %v1129_v27 }
  0x2d   :  { %564 = vmatpush2.msra.mxu0 %v1189_v36  ;;  %867 = vmatprep.subr.mxu1 %v984_v3 }
  0x2e   :  { %831 = vmatmul.mubr.msk.f32.gmra.mxu0 %vm72_vm0, %v29_v34  ;;  %565 = vmatprep.subr.mxu0 %v984_v3 }
  0x2f   :  { %293 = vmatprep.mubr.f32.mxu0 %v984_v3  ;;  %566 = vmatpush2.msra.mxu0 %v1200_v38 }
  0x30   :  { %567 = vmatprep.subr.mxu0 %v984_v3  ;;  %899 = vmatpush1.msra.mxu1 %v1140_v29 }
  0x31   :  { %568 = vmatpush2.msra.mxu0 %v1209_v39  ;;  %868 = vmatprep.subr.mxu1 %v984_v3 }
  0x32   :  { %832 = vmatmul.mubr.msk.f32.gmra.mxu0 %vm72_vm0, %v30_v37  ;;  %569 = vmatprep.subr.mxu0 %v984_v3 }
  0x33   :  { %299 = vmatprep.mubr.f32.mxu0 %v984_v3  ;;  %570 = vmatpush2.msra.mxu0 %v1220_v41 }
  0x34   :  { %571 = vmatprep.subr.mxu0 %v984_v3  ;;  %900 = vmatpush1.msra.mxu1 %v1149_v30 }
  0x35   :  { %572 = vmatpush2.msra.mxu0 %v1229_v42  ;;  %869 = vmatprep.subr.mxu1 %v984_v3 }
  0x36   :  { %833 = vmatmul.mubr.msk.f32.gmra.mxu0 %vm72_vm0, %v31_v40  ;;  %573 = vmatprep.subr.mxu0 %v984_v3 }
  0x37   :  { %305 = vmatprep.mubr.f32.mxu0 %v984_v3  ;;  %574 = vmatpush2.msra.mxu0 %v1240_v44 }
  0x38   :  { %575 = vmatprep.subr.mxu0 %v984_v3  ;;  %901 = vmatpush1.msra.mxu1 %v1160_v32 }
  0x39   :  { %576 = vmatpush2.msra.mxu0 %v1250_v45  ;;  %870 = vmatprep.subr.mxu1 %v984_v3 }
  0x3a   :  { %834 = vmatmul.mubr.msk.f32.gmra.mxu0 %vm72_vm0, %v32_v43  ;;  %577 = vmatprep.subr.mxu0 %v984_v3 }
  0x3b   :  { %311 = vmatprep.mubr.f32.mxu0 %v984_v3  ;;  %578 = vmatpush2.msra.mxu0 %v1261_v47 }
  0x3c   :  { %579 = vmatprep.subr.mxu0 %v984_v3  ;;  %902 = vmatpush1.msra.mxu1 %v1169_v33 }
  0x3d   :  { %580 = vmatpush2.msra.mxu0 %v1271_v48  ;;  %871 = vmatprep.subr.mxu1 %v984_v3 }
  0x3e   :  { %835 = vmatmul.mubr.msk.f32.gmra.mxu0 %vm72_vm0, %v33_v46  ;;  %581 = vmatprep.subr.mxu0 %v984_v3 }
  0x3f   :  { %317 = vmatprep.mubr.f32.mxu0 %v984_v3  ;;  %582 = vmatpush2.msra.mxu0 %v1283_v50 }
  0x40   :  { %583 = vmatprep.subr.mxu0 %v984_v3  ;;  %903 = vmatpush2.msra.mxu1 %v1180_v35 }
  0x41   :  { %584 = vmatpush2.msra.mxu0 %v1292_v51  ;;  %872 = vmatprep.subr.mxu1 %v984_v3 }
  0x42   :  { %836 = vmatmul.mubr.msk.f32.gmra.mxu0 %vm72_vm0, %v34_v49  ;;  %585 = vmatprep.subr.mxu0 %v984_v3 }
  0x43   :  { %323 = vmatprep.mubr.f32.mxu0 %v984_v3  ;;  %586 = vmatpush2.msra.mxu0 %v509_v54 }
  0x44   :  { %587 = vmatprep.subr.mxu0 %v984_v3  ;;  %904 = vmatpush2.msra.mxu1 %v1189_v36 }
  0x45   :  { %588 = vmatpush2.msra.mxu0 %v508_v56  ;;  %873 = vmatprep.subr.mxu1 %v984_v3 }
  0x46   :  { %837 = vmatmul.mubr.msk.f32.gmra.mxu0 %vm72_vm0, %v35_v52  ;;  %589 = vmatprep.subr.mxu0 %v984_v3 }
  0x47   :  { %329 = vmatprep.mubr.f32.mxu0 %v984_v3  ;;  %590 = vmatpush2.msra.mxu0 %v507_v57 }
  0x48   :  { %591 = vmatprep.subr.mxu0 %v984_v3  ;;  %905 = vmatpush2.msra.mxu1 %v1200_v38 }
  0x49   :  { %592 = vmatpush2.msra.mxu0 %v506_v59  ;;  %874 = vmatprep.subr.mxu1 %v984_v3 }
  0x4a   :  { %838 = vmatmul.mubr.msk.f32.gmra.mxu0 %vm72_vm0, %v36_v53  ;;  %906 = vmatpush2.msra.mxu1 %v1209_v39 }
  0x4b   :  { %335 = vmatprep.mubr.f32.mxu0 %v984_v3  ;;  %875 = vmatprep.subr.mxu1 %v984_v3 }
  0x4c   :  { %907 = vmatpush2.msra.mxu1 %v1220_v41 }
  0x4d   :  { %876 = vmatprep.subr.mxu1 %v984_v3 }
  0x4e   :  { %839 = vmatmul.mubr.msk.f32.gmra.mxu0 %vm72_vm0, %v37_v55  ;;  %908 = vmatpush2.msra.mxu1 %v1229_v42 }
  0x4f   :  { %341 = vmatprep.mubr.f32.mxu0 %v984_v3  ;;  %877 = vmatprep.subr.mxu1 %v984_v3 }
  0x50   :  { %909 = vmatpush2.msra.mxu1 %v1240_v44 }
  0x51   :  { %878 = vmatprep.subr.mxu1 %v984_v3 }
  0x52   :  { %840 = vmatmul.mubr.msk.f32.gmra.mxu0 %vm72_vm0, %v38_v58  ;;  %910 = vmatpush2.msra.mxu1 %v1250_v45 }
  0x53   :  { %347 = vmatprep.mubr.f32.mxu0 %v984_v3  ;;  %879 = vmatprep.subr.mxu1 %v984_v3 }
  0x54   :  { %911 = vmatpush2.msra.mxu1 %v1261_v47 }
  0x55   :  { %880 = vmatprep.subr.mxu1 %v984_v3 }
  0x56   :  { %841 = vmatmul.mubr.msk.f32.gmra.mxu0 %vm72_vm0, %v39_v60  ;;  %912 = vmatpush2.msra.mxu1 %v1271_v48 }
  0x57   :  { %353 = vmatprep.mubr.f32.mxu0 %v984_v3  ;;  %881 = vmatprep.subr.mxu1 %v984_v3 }
  0x58   :  { %913 = vmatpush2.msra.mxu1 %v1283_v50 }
  0x59   :  { %882 = vmatprep.subr.mxu1 %v984_v3 }
  0x5a   :  { %842 = vmatmul.mubr.msk.f32.gmra.mxu0 %vm72_vm0, %v40_v61  ;;  %914 = vmatpush2.msra.mxu1 %v1292_v51 }
  0x5b   :  { %359 = vmatprep.mubr.f32.mxu0 %v984_v3  ;;  %883 = vmatprep.subr.mxu1 %v984_v3 }
  0x5c   :  { %915 = vmatpush2.msra.mxu1 %v509_v54 }
  0x5d   :  { %884 = vmatprep.subr.mxu1 %v984_v3 }
  0x5e   :  { %843 = vmatmul.mubr.msk.f32.gmra.mxu0 %vm72_vm0, %v41_v62  ;;  %916 = vmatpush2.msra.mxu1 %v508_v56 }
  0x5f   :  { %365 = vmatprep.mubr.f32.mxu0 %v984_v3  ;;  %885 = vmatprep.subr.mxu1 %v984_v3 }
  0x60   :  { %917 = vmatpush2.msra.mxu1 %v507_v57 }
  0x61   :  { %886 = vmatprep.subr.mxu1 %v984_v3 }
  0x62   :  { %844 = vmatmul.mubr.msk.f32.gmra.mxu0 %vm72_vm0, %v42_v63  ;;  %918 = vmatpush2.msra.mxu1 %v506_v59 }
  0x63   :  { %371 = vmatprep.mubr.f32.mxu0 %v984_v3 }
  0x66   :  { %845 = vmatmul.mubr.msk.f32.gmra.mxu0 %vm72_vm0, %v43_v0 }
  0x67   :  { %377 = vmatprep.mubr.f32.mxu0 %v984_v3 }
  0x6a   :  { %846 = vmatmul.mubr.msk.f32.gmra.mxu0 %vm72_vm0, %v44_v1 }
  0x6b   :  { %383 = vmatprep.mubr.f32.mxu0 %v984_v3 }
  0x6e   :  { %847 = vmatmul.mubr.msk.f32.gmra.mxu0 %vm72_vm0, %v45_v2 }
  0x6f   :  { %389 = vmatprep.mubr.f32.mxu0 %v984_v3 }
  0x72   :  { %848 = vmatmul.mubr.msk.f32.gmra.mxu0 %vm72_vm0, %v46_v4 }
  0x73   :  { %395 = vmatprep.mubr.f32.mxu0 %v984_v3 }
  0x76   :  { %849 = vmatmul.mubr.msk.f32.gmra.mxu0 %vm72_vm0, %v47_v5 }
  0x77   :  { %401 = vmatprep.mubr.f32.mxu0 %v984_v3 }
  0x7a   :  { %850 = vmatmul.mubr.msk.f32.gmra.mxu0 %vm72_vm0, %v48_v6 }
  0x7b   :  { %407 = vmatprep.mubr.f32.mxu0 %v984_v3 }
  0x7e   :  { %851 = vmatmul.mubr.msk.f32.gmra.mxu0 %vm72_vm0, %v49_v7 }
  0x7f   :  { %413 = vmatprep.mubr.f32.mxu0 %v984_v3 }
  0x82   :  { %852 = vmatmul.mubr.msk.f32.gmra.mxu0 %vm72_vm0, %v50_v8 }
  0x83   :  { %419 = vmatprep.mubr.f32.mxu0 %v984_v3 }
  0x86   :  { %853 = vmatmul.mubr.msk.f32.gmra.mxu0 %vm72_vm0, %v51_v9 }
  0xca   :  { %v235_v17 = vpop.f32.mrf.mxu0 }
  0xcb   :  { %v236_v3 = vadd.f32 %v235_v17, %v1434_v15 }
  0xcc   :  { %v237_v18 = vpop.f32.mrf.mxu0 }
  0xcd   :  { %v238_v19 = vadd.f32 %v237_v18, %v1436_v16  ;;  %v426_v22 = vmax.f32 %v236_v3, 0.0 }
  0xce   :  { %v241_v20 = vpop.f32.mrf.mxu0 }
  0xcf   :  { %v427_v21 = vmax.f32 %v238_v19, 0.0  ;;  %v242_v23 = vadd.f32 %v241_v20, %v1434_v15 }
  0xd0   :  { %v243_v24 = vpop.f32.mrf.mxu0 }
  0xd1   :  { %v244_v25 = vadd.f32 %v243_v24, %v1436_v16  ;;  %593 = vmatprep.mubr.f32.mxu0 %v427_v21  ;;  %v428_v28 = vmax.f32 %v242_v23, 0.0 }
  0xd2   :  { %v247_v26 = vpop.f32.mrf.mxu0  ;;  %594 = vmatmul.mubr.f32.vlgmr.msra.gmra.mxu0 %v426_v22 }
  0xd3   :  { %v429_v27 = vmax.f32 %v244_v25, 0.0  ;;  %v248_v29 = vadd.f32 %v247_v26, %v1434_v15 }
  0xd4   :  { %v249_v30 = vpop.f32.mrf.mxu0 }
  0xd5   :  { %v250_v31 = vadd.f32 %v249_v30, %v1436_v16  ;;  %598 = vmatprep.mubr.f32.mxu0 %v429_v27  ;;  %v430_v34 = vmax.f32 %v248_v29, 0.0 }
  0xd6   :  { %v253_v32 = vpop.f32.mrf.mxu0  ;;  %599 = vmatmul.mubr.f32.gmra.mxu0 %v428_v28 }
  0xd7   :  { %v431_v33 = vmax.f32 %v250_v31, 0.0  ;;  %v254_v35 = vadd.f32 %v253_v32, %v1434_v15 }
  0xd8   :  { %v255_v36 = vpop.f32.mrf.mxu0 }
  0xd9   :  { %v256_v37 = vadd.f32 %v255_v36, %v1436_v16  ;;  %603 = vmatprep.mubr.f32.mxu0 %v431_v33  ;;  %v432_v40 = vmax.f32 %v254_v35, 0.0 }
  0xda   :  { %v259_v38 = vpop.f32.mrf.mxu0  ;;  %604 = vmatmul.mubr.f32.gmra.mxu0 %v430_v34 }
  0xdb   :  { %v433_v39 = vmax.f32 %v256_v37, 0.0  ;;  %v260_v41 = vadd.f32 %v259_v38, %v1434_v15 }
  0xdc   :  { %v261_v42 = vpop.f32.mrf.mxu0 }
  0xdd   :  { %v262_v43 = vadd.f32 %v261_v42, %v1436_v16  ;;  %608 = vmatprep.mubr.f32.mxu0 %v433_v39  ;;  %v434_v46 = vmax.f32 %v260_v41, 0.0 }
  0xde   :  { %v265_v44 = vpop.f32.mrf.mxu0  ;;  %609 = vmatmul.mubr.f32.gmra.mxu0 %v432_v40 }
  0xdf   :  { %v435_v45 = vmax.f32 %v262_v43, 0.0  ;;  %v266_v47 = vadd.f32 %v265_v44, %v1434_v15 }
  0xe0   :  { %v267_v48 = vpop.f32.mrf.mxu0 }
  0xe1   :  { %v268_v49 = vadd.f32 %v267_v48, %v1436_v16  ;;  %613 = vmatprep.mubr.f32.mxu0 %v435_v45  ;;  %v436_v52 = vmax.f32 %v266_v47, 0.0 }
  0xe2   :  { %v271_v50 = vpop.f32.mrf.mxu0  ;;  %614 = vmatmul.mubr.f32.gmra.mxu0 %v434_v46 }
  0xe3   :  { %v437_v51 = vmax.f32 %v268_v49, 0.0  ;;  %v272_v53 = vadd.f32 %v271_v50, %v1434_v15 }
  0xe4   :  { %v273_v54 = vpop.f32.mrf.mxu0 }
  0xe5   :  { %v274_v55 = vadd.f32 %v273_v54, %v1436_v16  ;;  %618 = vmatprep.mubr.f32.mxu0 %v437_v51  ;;  %v438_v58 = vmax.f32 %v272_v53, 0.0 }
  0xe6   :  { %v277_v56 = vpop.f32.mrf.mxu0  ;;  %619 = vmatmul.mubr.f32.gmra.mxu0 %v436_v52 }
  0xe7   :  { %v439_v57 = vmax.f32 %v274_v55, 0.0  ;;  %v278_v59 = vadd.f32 %v277_v56, %v1434_v15 }
  0xe8   :  { %v279_v60 = vpop.f32.mrf.mxu0 }
  0xe9   :  { %623 = vmatprep.mubr.f32.mxu0 %v439_v57  ;;  %v280_v61 = vadd.f32 %v279_v60, %v1436_v16  ;;  %v440_v0 = vmax.f32 %v278_v59, 0.0 }
  0xea   :  { %v283_v62 = vpop.f32.mrf.mxu0  ;;  %624 = vmatmul.mubr.f32.gmra.mxu0 %v438_v58 }
  0xeb   :  { %v441_v63 = vmax.f32 %v280_v61, 0.0  ;;  %v284_v1 = vadd.f32 %v283_v62, %v1434_v15 }
  0xec   :  { %v285_v2 = vpop.f32.mrf.mxu0 }
  0xed   :  { %v286_v4 = vadd.f32 %v285_v2, %v1436_v16  ;;  %628 = vmatprep.mubr.f32.mxu1 %v441_v63  ;;  %v442_v7 = vmax.f32 %v284_v1, 0.0 }
  0xee   :  { %v289_v5 = vpop.f32.mrf.mxu0  ;;  %629 = vmatmul.mubr.f32.vlgmr.msra.gmra.mxu1 %v440_v0 }
  0xef   :  { %v443_v6 = vmax.f32 %v286_v4, 0.0  ;;  %v290_v8 = vadd.f32 %v289_v5, %v1434_v15 }
  0xf0   :  { %v291_v9 = vpop.f32.mrf.mxu0 }
  0xf1   :  { %v292_v10 = vadd.f32 %v291_v9, %v1436_v16  ;;  %633 = vmatprep.mubr.f32.mxu1 %v443_v6  ;;  %v444_v13 = vmax.f32 %v290_v8, 0.0 }
  0xf2   :  { %v295_v11 = vpop.f32.mrf.mxu0  ;;  %634 = vmatmul.mubr.f32.gmra.mxu1 %v442_v7 }
  0xf3   :  { %v445_v12 = vmax.f32 %v292_v10, 0.0  ;;  %v296_v14 = vadd.f32 %v295_v11, %v1434_v15 }
  0xf4   :  { %v297_v17 = vpop.f32.mrf.mxu0 }
  0xf5   :  { %v298_v3 = vadd.f32 %v297_v17, %v1436_v16  ;;  %638 = vmatprep.mubr.f32.mxu1 %v445_v12  ;;  %v446_v20 = vmax.f32 %v296_v14, 0.0 }
  0xf6   :  { %v301_v18 = vpop.f32.mrf.mxu0  ;;  %639 = vmatmul.mubr.f32.gmra.mxu1 %v444_v13 }
  0xf7   :  { %v447_v19 = vmax.f32 %v298_v3, 0.0  ;;  %v302_v21 = vadd.f32 %v301_v18, %v1434_v15 }
  0xf8   :  { %v303_v22 = vpop.f32.mrf.mxu0 }
  0xf9   :  { %v304_v23 = vadd.f32 %v303_v22, %v1436_v16  ;;  %643 = vmatprep.mubr.f32.mxu1 %v447_v19  ;;  %v448_v26 = vmax.f32 %v302_v21, 0.0 }
  0xfa   :  { %v307_v24 = vpop.f32.mrf.mxu0  ;;  %644 = vmatmul.mubr.f32.gmra.mxu1 %v446_v20 }
  0xfb   :  { %v449_v25 = vmax.f32 %v304_v23, 0.0  ;;  %v308_v27 = vadd.f32 %v307_v24, %v1434_v15 }
  0xfc   :  { %v309_v28 = vpop.f32.mrf.mxu0 }
  0xfd   :  { %v310_v29 = vadd.f32 %v309_v28, %v1436_v16  ;;  %648 = vmatprep.mubr.f32.mxu1 %v449_v25  ;;  %v450_v32 = vmax.f32 %v308_v27, 0.0 }
  0xfe   :  { %v313_v30 = vpop.f32.mrf.mxu0  ;;  %649 = vmatmul.mubr.f32.gmra.mxu1 %v448_v26 }
  0xff   :  { %v451_v31 = vmax.f32 %v310_v29, 0.0  ;;  %v314_v33 = vadd.f32 %v313_v30, %v1434_v15 }
 0x100   :  { %v315_v34 = vpop.f32.mrf.mxu0 }
 0x101   :  { %v316_v35 = vadd.f32 %v315_v34, %v1436_v16  ;;  %653 = vmatprep.mubr.f32.mxu1 %v451_v31  ;;  %v452_v38 = vmax.f32 %v314_v33, 0.0 }
 0x102   :  { %v319_v36 = vpop.f32.mrf.mxu0  ;;  %654 = vmatmul.mubr.f32.gmra.mxu1 %v450_v32 }
 0x103   :  { %v453_v37 = vmax.f32 %v316_v35, 0.0  ;;  %v320_v39 = vadd.f32 %v319_v36, %v1434_v15 }
 0x104   :  { %v321_v40 = vpop.f32.mrf.mxu0 }
 0x105   :  { %v322_v41 = vadd.f32 %v321_v40, %v1436_v16  ;;  %658 = vmatprep.mubr.f32.mxu1 %v453_v37  ;;  %v454_v44 = vmax.f32 %v320_v39, 0.0 }
 0x106   :  { %v325_v42 = vpop.f32.mrf.mxu0  ;;  %659 = vmatmul.mubr.f32.gmra.mxu1 %v452_v38 }
 0x107   :  { %v455_v43 = vmax.f32 %v322_v41, 0.0  ;;  %v326_v45 = vadd.f32 %v325_v42, %v1434_v15 }
 0x108   :  { %v327_v46 = vpop.f32.mrf.mxu0 }
 0x109   :  { %v328_v47 = vadd.f32 %v327_v46, %v1436_v16  ;;  %663 = vmatprep.mubr.f32.mxu1 %v455_v43  ;;  %v456_v50 = vmax.f32 %v326_v45, 0.0 }
 0x10a   :  { %v331_v48 = vpop.f32.mrf.mxu0  ;;  %664 = vmatmul.mubr.f32.gmra.mxu1 %v454_v44 }
 0x10b   :  { %v457_v49 = vmax.f32 %v328_v47, 0.0  ;;  %v332_v51 = vadd.f32 %v331_v48, %v1434_v15 }
 0x10c   :  { %v333_v52 = vpop.f32.mrf.mxu0 }
 0x10d   :  { %v334_v53 = vadd.f32 %v333_v52, %v1436_v16  ;;  %668 = vmatprep.mubr.f32.mxu1 %v457_v49  ;;  %v458_v56 = vmax.f32 %v332_v51, 0.0 }
 0x10e   :  { %v337_v54 = vpop.f32.mrf.mxu0  ;;  %669 = vmatmul.mubr.f32.gmra.mxu1 %v456_v50 }
 0x10f   :  { %v459_v55 = vmax.f32 %v334_v53, 0.0  ;;  %v338_v57 = vadd.f32 %v337_v54, %v1434_v15 }
 0x110   :  { %v339_v58 = vpop.f32.mrf.mxu0 }
 0x111   :  { %v340_v59 = vadd.f32 %v339_v58, %v1436_v16  ;;  %673 = vmatprep.mubr.f32.mxu1 %v459_v55  ;;  %v460_v62 = vmax.f32 %v338_v57, 0.0 }
 0x112   :  { %v343_v60 = vpop.f32.mrf.mxu0  ;;  %674 = vmatmul.mubr.f32.gmra.mxu1 %v458_v56 }
 0x113   :  { %v461_v61 = vmax.f32 %v340_v59, 0.0  ;;  %v344_v63 = vadd.f32 %v343_v60, %v1434_v15 }
 0x114   :  { %v345_v0 = vpop.f32.mrf.mxu0 }
 0x115   :  { %v346_v1 = vadd.f32 %v345_v0, %v1436_v16  ;;  %678 = vmatprep.mubr.f32.mxu1 %v461_v61  ;;  %v462_v5 = vmax.f32 %v344_v63, 0.0 }
 0x116   :  { %v349_v2 = vpop.f32.mrf.mxu0  ;;  %679 = vmatmul.mubr.f32.gmra.mxu1 %v460_v62 }
 0x117   :  { %v463_v4 = vmax.f32 %v346_v1, 0.0  ;;  %v350_v6 = vadd.f32 %v349_v2, %v1434_v15 }
 0x118   :  { %v351_v7 = vpop.f32.mrf.mxu0 }
 0x119   :  { %v352_v8 = vadd.f32 %v351_v7, %v1436_v16  ;;  %683 = vmatprep.mubr.f32.mxu1 %v463_v4  ;;  %v464_v11 = vmax.f32 %v350_v6, 0.0 }
 0x11a   :  { %v355_v9 = vpop.f32.mrf.mxu0  ;;  %684 = vmatmul.mubr.f32.gmra.mxu1 %v462_v5 }
 0x11b   :  { %v465_v10 = vmax.f32 %v352_v8, 0.0  ;;  %v356_v12 = vadd.f32 %v355_v9, %v1434_v15 }
 0x11c   :  { %v357_v13 = vpop.f32.mrf.mxu0 }
 0x11d   :  { %v358_v14 = vadd.f32 %v357_v13, %v1436_v16  ;;  %688 = vmatprep.mubr.f32.mxu1 %v465_v10  ;;  %v466_v18 = vmax.f32 %v356_v12, 0.0 }
 0x11e   :  { %v361_v17 = vpop.f32.mrf.mxu0  ;;  %689 = vmatmul.mubr.f32.gmra.mxu1 %v464_v11 }
 0x11f   :  { %v467_v3 = vmax.f32 %v358_v14, 0.0  ;;  %v362_v19 = vadd.f32 %v361_v17, %v1434_v15 }
 0x120   :  { %v363_v20 = vpop.f32.mrf.mxu0 }
 0x121   :  { %v364_v21 = vadd.f32 %v363_v20, %v1436_v16  ;;  %693 = vmatprep.mubr.f32.mxu1 %v467_v3  ;;  %v468_v24 = vmax.f32 %v362_v19, 0.0 }
 0x122   :  { %v367_v22 = vpop.f32.mrf.mxu0  ;;  %694 = vmatmul.mubr.f32.gmra.mxu1 %v466_v18 }
 0x123   :  { %v469_v23 = vmax.f32 %v364_v21, 0.0  ;;  %v368_v25 = vadd.f32 %v367_v22, %v1434_v15  ;;  %v1505_v22 = vld [vmem:[%s1671_s4] ss:$0 sm:$0xff] }
 0x124   :  { %v369_v26 = vpop.f32.mrf.mxu0 }
 0x125   :  { %v370_v27 = vadd.f32 %v369_v26, %v1436_v16  ;;  %698 = vmatprep.mubr.f32.mxu1 %v469_v23  ;;  %v470_v30 = vmax.f32 %v368_v25, 0.0 }
 0x126   :  { %v373_v28 = vpop.f32.mrf.mxu0  ;;  %699 = vmatmul.mubr.f32.gmra.mxu1 %v468_v24 }
 0x127   :  { %v471_v29 = vmax.f32 %v370_v27, 0.0  ;;  %v374_v31 = vadd.f32 %v373_v28, %v1434_v15 }
 0x128   :  { %v375_v32 = vpop.f32.mrf.mxu0 }
 0x129   :  { %v376_v33 = vadd.f32 %v375_v32, %v1436_v16  ;;  %703 = vmatprep.mubr.f32.mxu1 %v471_v29  ;;  %v472_v36 = vmax.f32 %v374_v31, 0.0 }
 0x12a   :  { %v379_v34 = vpop.f32.mrf.mxu0  ;;  %704 = vmatmul.mubr.f32.gmra.mxu1 %v470_v30 }
 0x12b   :  { %v473_v35 = vmax.f32 %v376_v33, 0.0  ;;  %v380_v37 = vadd.f32 %v379_v34, %v1434_v15 }
 0x12c   :  { %v381_v38 = vpop.f32.mrf.mxu0 }
 0x12d   :  { %v382_v39 = vadd.f32 %v381_v38, %v1436_v16  ;;  %708 = vmatprep.mubr.f32.mxu1 %v473_v35  ;;  %v474_v42 = vmax.f32 %v380_v37, 0.0 }
 0x12e   :  { %v385_v40 = vpop.f32.mrf.mxu0  ;;  %709 = vmatmul.mubr.f32.gmra.mxu1 %v472_v36 }
 0x12f   :  { %v475_v41 = vmax.f32 %v382_v39, 0.0  ;;  %v386_v43 = vadd.f32 %v385_v40, %v1434_v15 }
 0x130   :  { %v387_v44 = vpop.f32.mrf.mxu0 }
 0x131   :  { %v388_v45 = vadd.f32 %v387_v44, %v1436_v16  ;;  %713 = vmatprep.mubr.f32.mxu1 %v475_v41  ;;  %v476_v48 = vmax.f32 %v386_v43, 0.0 }
 0x132   :  { %v391_v46 = vpop.f32.mrf.mxu0  ;;  %714 = vmatmul.mubr.f32.gmra.mxu1 %v474_v42 }
 0x133   :  { %v477_v47 = vmax.f32 %v388_v45, 0.0  ;;  %v392_v49 = vadd.f32 %v391_v46, %v1434_v15 }
 0x134   :  { %v393_v50 = vpop.f32.mrf.mxu0 }
 0x135   :  { %v394_v51 = vadd.f32 %v393_v50, %v1436_v16  ;;  %718 = vmatprep.mubr.f32.mxu1 %v477_v47  ;;  %v478_v54 = vmax.f32 %v392_v49, 0.0 }
 0x136   :  { %v397_v52 = vpop.f32.mrf.mxu0  ;;  %719 = vmatmul.mubr.f32.gmra.mxu1 %v476_v48 }
 0x137   :  { %v479_v53 = vmax.f32 %v394_v51, 0.0  ;;  %v398_v55 = vadd.f32 %v397_v52, %v1434_v15 }
 0x138   :  { %v399_v56 = vpop.f32.mrf.mxu0 }
 0x139   :  { %v400_v57 = vadd.f32 %v399_v56, %v1436_v16  ;;  %723 = vmatprep.mubr.f32.mxu1 %v479_v53  ;;  %v480_v60 = vmax.f32 %v398_v55, 0.0 }
 0x13a   :  { %v403_v58 = vpop.f32.mrf.mxu0  ;;  %724 = vmatmul.mubr.f32.gmra.mxu1 %v478_v54 }
 0x13b   :  { %v481_v59 = vmax.f32 %v400_v57, 0.0  ;;  %v404_v61 = vadd.f32 %v403_v58, %v1434_v15 }
 0x13c   :  { %v405_v62 = vpop.f32.mrf.mxu0 }
 0x13d   :  { %v406_v63 = vadd.f32 %v405_v62, %v1436_v16  ;;  %728 = vmatprep.mubr.f32.mxu1 %v481_v59  ;;  %v482_v2 = vmax.f32 %v404_v61, 0.0 }
 0x13e   :  { %v409_v0 = vpop.f32.mrf.mxu0  ;;  %729 = vmatmul.mubr.f32.gmra.mxu1 %v480_v60 }
 0x13f   :  { %v483_v1 = vmax.f32 %v406_v63, 0.0  ;;  %v410_v4 = vadd.f32 %v409_v0, %v1434_v15 }
 0x140   :  { %v411_v5 = vpop.f32.mrf.mxu0 }
 0x141   :  { %v412_v6 = vadd.f32 %v411_v5, %v1436_v16  ;;  %733 = vmatprep.mubr.f32.mxu1 %v483_v1  ;;  %v484_v9 = vmax.f32 %v410_v4, 0.0 }
 0x142   :  { %v415_v7 = vpop.f32.mrf.mxu0  ;;  %734 = vmatmul.mubr.f32.gmra.mxu1 %v482_v2 }
 0x143   :  { %v485_v8 = vmax.f32 %v412_v6, 0.0  ;;  %v416_v10 = vadd.f32 %v415_v7, %v1434_v15 }
 0x144   :  { %v417_v11 = vpop.f32.mrf.mxu0 }
 0x145   :  { %v418_v12 = vadd.f32 %v417_v11, %v1436_v16  ;;  %738 = vmatprep.mubr.f32.mxu1 %v485_v8  ;;  %v486_v17 = vmax.f32 %v416_v10, 0.0 }
 0x146   :  { %v421_v13 = vpop.f32.mrf.mxu0  ;;  %739 = vmatmul.mubr.f32.gmra.mxu1 %v484_v9 }
 0x147   :  { %v487_v14 = vmax.f32 %v418_v12, 0.0  ;;  %v422_v3 = vadd.f32 %v421_v13, %v1434_v15 }
 0x148   :  { %v423_v18 = vpop.f32.mrf.mxu0 }
 0x149   :  { %v424_v19 = vadd.f32 %v423_v18, %v1436_v16  ;;  %743 = vmatprep.mubr.f32.mxu1 %v487_v14  ;;  %v488_v21 = vmax.f32 %v422_v3, 0.0 }
 0x14a   :  { %744 = vmatmul.mubr.f32.gmra.mxu1 %v486_v17 }
 0x14b   :  { %v489_v20 = vmax.f32 %v424_v19, 0.0 }
 0x14d   :  { %748 = vmatprep.mubr.f32.mxu1 %v489_v20 }
 0x14e   :  { %749 = vmatmul.mubr.f32.gmra.mxu1 %v488_v21 }
 0x192   :  { %v595_v23 = vpop.f32.mrf.mxu0 }
 0x193   :  { %v596_v24 = vadd.f32 %v1505_v22, %v595_v23 }
 0x194   :  { %v597_v25 = vpop.f32.mrf.mxu0 }
 0x195   :  { %920 = vtanh.f32 %v596_v24 }
 0x196   :  { %v600_v15 = vpop.f32.mrf.mxu0 }
 0x197   :  { %v601_v26 = vadd.f32 %v1505_v22, %v600_v15 }
 0x198   :  { %v602_v16 = vpop.f32.mrf.mxu0 }
 0x199   :  { %922 = vtanh.f32 %v601_v26 }
 0x19a   :  { %v605_v27 = vpop.f32.mrf.mxu0 }
 0x19b   :  { %v606_v28 = vadd.f32 %v1505_v22, %v605_v27 }
 0x19c   :  { %v607_v29 = vpop.f32.mrf.mxu0 }
 0x19d   :  { %924 = vtanh.f32 %v606_v28 }
 0x19e   :  { %v610_v30 = vpop.f32.mrf.mxu0 }
 0x19f   :  { %v611_v31 = vadd.f32 %v1505_v22, %v610_v30 }
 0x1a0   :  { %v612_v32 = vpop.f32.mrf.mxu0 }
 0x1a1   :  { %926 = vtanh.f32 %v611_v31 }
 0x1a2   :  { %v921_v33 = vpop.eup %920  ;;  %v615_v34 = vpop.f32.mrf.mxu0 }
 0x1a3   :  { %786 = vst.msk [vmem:[%s1672_s5] sm:$0xff] %vm72_vm0, %v921_v33  ;;  %v616_v35 = vadd.f32 %v1505_v22, %v615_v34 }
 0x1a4   :  { %v617_v36 = vpop.f32.mrf.mxu0 }
 0x1a5   :  { %928 = vtanh.f32 %v616_v35 }
 0x1a6   :  { %v923_v37 = vpop.eup %922  ;;  %v620_v38 = vpop.f32.mrf.mxu0 }
 0x1a7   :  { %787 = vst.msk [vmem:[%s1672_s5 + $0x8] sm:$0xff] %vm72_vm0, %v923_v37  ;;  %v621_v39 = vadd.f32 %v1505_v22, %v620_v38 }
 0x1a8   :  { %v622_v40 = vpop.f32.mrf.mxu0 }
 0x1a9   :  { %930 = vtanh.f32 %v621_v39 }
 0x1aa   :  { %v925_v41 = vpop.eup %924  ;;  %v625_v42 = vpop.f32.mrf.mxu0 }
 0x1ab   :  { %788 = vst.msk [vmem:[%s1672_s5 + $0x10] sm:$0xff] %vm72_vm0, %v925_v41  ;;  %v626_v43 = vadd.f32 %v1505_v22, %v625_v42 }
 0x1ac   :  { %v627_v44 = vpop.f32.mrf.mxu0 }
 0x1ad   :  { %932 = vtanh.f32 %v626_v43 }
 0x1ae   :  { %v927_v45 = vpop.eup %926  ;;  %v630_v46 = vpop.f32.mrf.mxu1 }
 0x1af   :  { %789 = vst.msk [vmem:[%s1672_s5 + $0x18] sm:$0xff] %vm72_vm0, %v927_v45  ;;  %v631_v47 = vadd.f32 %v1505_v22, %v630_v46 }
 0x1b0   :  { %v632_v48 = vpop.f32.mrf.mxu1 }
 0x1b1   :  { %934 = vtanh.f32 %v631_v47 }
 0x1b2   :  { %v929_v49 = vpop.eup %928  ;;  %v635_v50 = vpop.f32.mrf.mxu1 }
 0x1b3   :  { %790 = vst.msk [vmem:[%s1672_s5 + $0x20] sm:$0xff] %vm72_vm0, %v929_v49  ;;  %v636_v51 = vadd.f32 %v1505_v22, %v635_v50 }
 0x1b4   :  { %v637_v52 = vpop.f32.mrf.mxu1 }
 0x1b5   :  { %936 = vtanh.f32 %v636_v51 }
 0x1b6   :  { %v931_v53 = vpop.eup %930  ;;  %v640_v54 = vpop.f32.mrf.mxu1 }
 0x1b7   :  { %791 = vst.msk [vmem:[%s1672_s5 + $0x28] sm:$0xff] %vm72_vm0, %v931_v53  ;;  %v641_v55 = vadd.f32 %v1505_v22, %v640_v54 }
 0x1b8   :  { %v642_v56 = vpop.f32.mrf.mxu1 }
 0x1b9   :  { %938 = vtanh.f32 %v641_v55 }
 0x1ba   :  { %v933_v57 = vpop.eup %932  ;;  %v645_v58 = vpop.f32.mrf.mxu1 }
 0x1bb   :  { %792 = vst.msk [vmem:[%s1672_s5 + $0x30] sm:$0xff] %vm72_vm0, %v933_v57  ;;  %v646_v59 = vadd.f32 %v1505_v22, %v645_v58 }
 0x1bc   :  { %v647_v60 = vpop.f32.mrf.mxu1 }
 0x1bd   :  { %940 = vtanh.f32 %v646_v59 }
 0x1be   :  { %v935_v61 = vpop.eup %934  ;;  %v650_v62 = vpop.f32.mrf.mxu1 }
 0x1bf   :  { %793 = vst.msk [vmem:[%s1672_s5 + $0x38] sm:$0xff] %vm72_vm0, %v935_v61  ;;  %v651_v63 = vadd.f32 %v1505_v22, %v650_v62 }
 0x1c0   :  { %v652_v0 = vpop.f32.mrf.mxu1 }
 0x1c1   :  { %942 = vtanh.f32 %v651_v63 }
 0x1c2   :  { %v937_v1 = vpop.eup %936  ;;  %v655_v2 = vpop.f32.mrf.mxu1 }
 0x1c3   :  { %794 = vst.msk [vmem:[%s1672_s5 + $0x40] sm:$0xff] %vm72_vm0, %v937_v1  ;;  %v656_v4 = vadd.f32 %v1505_v22, %v655_v2 }
 0x1c4   :  { %v657_v5 = vpop.f32.mrf.mxu1 }
 0x1c5   :  { %944 = vtanh.f32 %v656_v4 }
 0x1c6   :  { %v939_v6 = vpop.eup %938  ;;  %v660_v7 = vpop.f32.mrf.mxu1 }
 0x1c7   :  { %795 = vst.msk [vmem:[%s1672_s5 + $0x48] sm:$0xff] %vm72_vm0, %v939_v6  ;;  %v661_v8 = vadd.f32 %v1505_v22, %v660_v7 }
 0x1c8   :  { %v662_v9 = vpop.f32.mrf.mxu1 }
 0x1c9   :  { %946 = vtanh.f32 %v661_v8 }
 0x1ca   :  { %v941_v10 = vpop.eup %940  ;;  %v665_v11 = vpop.f32.mrf.mxu1 }
 0x1cb   :  { %796 = vst.msk [vmem:[%s1672_s5 + $0x50] sm:$0xff] %vm72_vm0, %v941_v10  ;;  %v666_v12 = vadd.f32 %v1505_v22, %v665_v11 }
 0x1cc   :  { %v667_v13 = vpop.f32.mrf.mxu1 }
 0x1cd   :  { %948 = vtanh.f32 %v666_v12 }
 0x1ce   :  { %v943_v14 = vpop.eup %942  ;;  %v670_v17 = vpop.f32.mrf.mxu1 }
 0x1cf   :  { %797 = vst.msk [vmem:[%s1672_s5 + $0x58] sm:$0xff] %vm72_vm0, %v943_v14  ;;  %v671_v3 = vadd.f32 %v1505_v22, %v670_v17 }
 0x1d0   :  { %v672_v18 = vpop.f32.mrf.mxu1 }
 0x1d1   :  { %950 = vtanh.f32 %v671_v3 }
 0x1d2   :  { %v945_v19 = vpop.eup %944  ;;  %v675_v20 = vpop.f32.mrf.mxu1 }
 0x1d3   :  { %798 = vst.msk [vmem:[%s1672_s5 + $0x60] sm:$0xff] %vm72_vm0, %v945_v19  ;;  %v676_v21 = vadd.f32 %v1505_v22, %v675_v20 }
 0x1d4   :  { %v677_v23 = vpop.f32.mrf.mxu1 }
 0x1d5   :  { %952 = vtanh.f32 %v676_v21 }
 0x1d6   :  { %v947_v24 = vpop.eup %946  ;;  %v680_v25 = vpop.f32.mrf.mxu1 }
 0x1d7   :  { %799 = vst.msk [vmem:[%s1672_s5 + $0x68] sm:$0xff] %vm72_vm0, %v947_v24  ;;  %v681_v15 = vadd.f32 %v1505_v22, %v680_v25 }
 0x1d8   :  { %v682_v26 = vpop.f32.mrf.mxu1 }
 0x1d9   :  { %954 = vtanh.f32 %v681_v15 }
 0x1da   :  { %v949_v16 = vpop.eup %948  ;;  %v685_v27 = vpop.f32.mrf.mxu1 }
 0x1db   :  { %800 = vst.msk [vmem:[%s1672_s5 + $0x70] sm:$0xff] %vm72_vm0, %v949_v16  ;;  %v686_v28 = vadd.f32 %v1505_v22, %v685_v27 }
 0x1dc   :  { %v687_v29 = vpop.f32.mrf.mxu1 }
 0x1dd   :  { %956 = vtanh.f32 %v686_v28 }
 0x1de   :  { %v951_v30 = vpop.eup %950  ;;  %v690_v31 = vpop.f32.mrf.mxu1 }
 0x1df   :  { %801 = vst.msk [vmem:[%s1672_s5 + $0x78] sm:$0xff] %vm72_vm0, %v951_v30  ;;  %v691_v32 = vadd.f32 %v1505_v22, %v690_v31 }
 0x1e0   :  { %v692_v33 = vpop.f32.mrf.mxu1 }
 0x1e1   :  { %958 = vtanh.f32 %v691_v32 }
 0x1e2   :  { %v953_v34 = vpop.eup %952  ;;  %v695_v35 = vpop.f32.mrf.mxu1 }
 0x1e3   :  { %802 = vst.msk [vmem:[%s1672_s5 + $0x80] sm:$0xff] %vm72_vm0, %v953_v34  ;;  %v696_v36 = vadd.f32 %v1505_v22, %v695_v35 }
 0x1e4   :  { %v697_v37 = vpop.f32.mrf.mxu1 }
 0x1e5   :  { %960 = vtanh.f32 %v696_v36 }
 0x1e6   :  { %v955_v38 = vpop.eup %954  ;;  %v700_v39 = vpop.f32.mrf.mxu1 }
 0x1e7   :  { %803 = vst.msk [vmem:[%s1672_s5 + $0x88] sm:$0xff] %vm72_vm0, %v955_v38  ;;  %v701_v40 = vadd.f32 %v1505_v22, %v700_v39 }
 0x1e8   :  { %v702_v41 = vpop.f32.mrf.mxu1 }
 0x1e9   :  { %962 = vtanh.f32 %v701_v40 }
 0x1ea   :  { %v957_v42 = vpop.eup %956  ;;  %v705_v43 = vpop.f32.mrf.mxu1 }
 0x1eb   :  { %804 = vst.msk [vmem:[%s1672_s5 + $0x90] sm:$0xff] %vm72_vm0, %v957_v42  ;;  %v706_v44 = vadd.f32 %v1505_v22, %v705_v43 }
 0x1ec   :  { %v707_v45 = vpop.f32.mrf.mxu1 }
 0x1ed   :  { %964 = vtanh.f32 %v706_v44 }
 0x1ee   :  { %v959_v46 = vpop.eup %958  ;;  %v710_v47 = vpop.f32.mrf.mxu1 }
 0x1ef   :  { %805 = vst.msk [vmem:[%s1672_s5 + $0x98] sm:$0xff] %vm72_vm0, %v959_v46  ;;  %v711_v48 = vadd.f32 %v1505_v22, %v710_v47 }
 0x1f0   :  { %v712_v49 = vpop.f32.mrf.mxu1 }
 0x1f1   :  { %966 = vtanh.f32 %v711_v48 }
 0x1f2   :  { %v961_v50 = vpop.eup %960  ;;  %v715_v51 = vpop.f32.mrf.mxu1 }
 0x1f3   :  { %806 = vst.msk [vmem:[%s1672_s5 + $0xa0] sm:$0xff] %vm72_vm0, %v961_v50  ;;  %v716_v52 = vadd.f32 %v1505_v22, %v715_v51 }
 0x1f4   :  { %v717_v53 = vpop.f32.mrf.mxu1 }
 0x1f5   :  { %968 = vtanh.f32 %v716_v52 }
 0x1f6   :  { %v963_v54 = vpop.eup %962  ;;  %v720_v55 = vpop.f32.mrf.mxu1 }
 0x1f7   :  { %807 = vst.msk [vmem:[%s1672_s5 + $0xa8] sm:$0xff] %vm72_vm0, %v963_v54  ;;  %v721_v56 = vadd.f32 %v1505_v22, %v720_v55 }
 0x1f8   :  { %v722_v57 = vpop.f32.mrf.mxu1 }
 0x1f9   :  { %970 = vtanh.f32 %v721_v56 }
 0x1fa   :  { %v965_v58 = vpop.eup %964  ;;  %v725_v59 = vpop.f32.mrf.mxu1 }
 0x1fb   :  { %808 = vst.msk [vmem:[%s1672_s5 + $0xb0] sm:$0xff] %vm72_vm0, %v965_v58  ;;  %v726_v60 = vadd.f32 %v1505_v22, %v725_v59 }
 0x1fc   :  { %v727_v61 = vpop.f32.mrf.mxu1 }
 0x1fd   :  { %972 = vtanh.f32 %v726_v60 }
 0x1fe   :  { %v967_v62 = vpop.eup %966  ;;  %v730_v63 = vpop.f32.mrf.mxu1 }
 0x1ff   :  { %809 = vst.msk [vmem:[%s1672_s5 + $0xb8] sm:$0xff] %vm72_vm0, %v967_v62  ;;  %v731_v0 = vadd.f32 %v1505_v22, %v730_v63 }
 0x200   :  { %v732_v1 = vpop.f32.mrf.mxu1 }
 0x201   :  { %974 = vtanh.f32 %v731_v0 }
 0x202   :  { %v969_v2 = vpop.eup %968  ;;  %v735_v4 = vpop.f32.mrf.mxu1 }
 0x203   :  { %810 = vst.msk [vmem:[%s1672_s5 + $0xc0] sm:$0xff] %vm72_vm0, %v969_v2  ;;  %v736_v5 = vadd.f32 %v1505_v22, %v735_v4 }
 0x204   :  { %v737_v6 = vpop.f32.mrf.mxu1 }
 0x205   :  { %976 = vtanh.f32 %v736_v5 }
 0x206   :  { %v971_v7 = vpop.eup %970  ;;  %v740_v8 = vpop.f32.mrf.mxu1 }
 0x207   :  { %811 = vst.msk [vmem:[%s1672_s5 + $0xc8] sm:$0xff] %vm72_vm0, %v971_v7  ;;  %v741_v9 = vadd.f32 %v1505_v22, %v740_v8 }
 0x208   :  { %v742_v10 = vpop.f32.mrf.mxu1 }
 0x209   :  { %978 = vtanh.f32 %v741_v9 }
 0x20a   :  { %v973_v11 = vpop.eup %972  ;;  %v745_v12 = vpop.f32.mrf.mxu1 }
 0x20b   :  { %812 = vst.msk [vmem:[%s1672_s5 + $0xd0] sm:$0xff] %vm72_vm0, %v973_v11  ;;  %v746_v13 = vadd.f32 %v1505_v22, %v745_v12 }
 0x20c   :  { %v747_v14 = vpop.f32.mrf.mxu1 }
 0x20d   :  { %980 = vtanh.f32 %v746_v13 }
 0x20e   :  { %v975_v17 = vpop.eup %974  ;;  %v750_v3 = vpop.f32.mrf.mxu1 }
 0x20f   :  { %813 = vst.msk [vmem:[%s1672_s5 + $0xd8] sm:$0xff] %vm72_vm0, %v975_v17  ;;  %v751_v18 = vadd.f32 %v1505_v22, %v750_v3 }
 0x210   :  { %v752_v19 = vpop.f32.mrf.mxu1 }
 0x211   :  { %982 = vtanh.f32 %v751_v18 }
 0x212   :  { %v977_v20 = vpop.eup %976 }
 0x213   :  { %814 = vst.msk [vmem:[%s1672_s5 + $0xe0] sm:$0xff] %vm72_vm0, %v977_v20 }
 0x216   :  { %v979_v21 = vpop.eup %978 }
 0x217   :  { %815 = vst.msk [vmem:[%s1672_s5 + $0xe8] sm:$0xff] %vm72_vm0, %v979_v21 }
 0x21a   :  { %v981_v23 = vpop.eup %980 }
 0x21b   :  { %816 = vst.msk [vmem:[%s1672_s5 + $0xf0] sm:$0xff] %vm72_vm0, %v981_v23 }
 0x21e   :  { %v983_v22 = vpop.eup %982 }
 0x21f   :  { %817 = vst.msk [vmem:[%s1672_s5 + $0xf8] sm:$0xff] %vm72_vm0, %v983_v22 }

</bundles_post_ra>
